<compile_context>
chip_gen: v5e
topology: v5e:2x2
jax: 0.10.0
libtpu: 0.0.40
codegen_flags: <defaults>
</compile_context>

<pallas_src>
import jax
import jax.numpy as jnp
from jax import lax
from jax.experimental import pallas as pl
from jax.experimental.pallas import tpu as pltpu

HIDDEN = 128


def _round_up(n, m):
    return ((n + m - 1) // m) * m


def _choose_tm(B, tm_max=1024):
    """Batch-tile policy.

    * B <= 128: one sublane-aligned tile covering the whole batch (grid=1);
      splitting a tiny batch only adds per-grid-step overhead.
    * B  > 128: at least 2 tiles (so the 'parallel' batch axis can shard across
      both v7x TensorCores), tile a multiple of 128 so the (1, tm) output row
      stays lane-dense / unmasked, capped at tm_max.  VMEM is nowhere near a
      limit for this tiny MLP even at tm in the thousands.
    """
    if B <= 128:
        return _round_up(max(B, 1), 8)
    return max(128, min(tm_max, _round_up(pl.cdiv(B, 2), 128)))


def value_mlp_kernel(x_ref, w1_ref, b1_ref, w2_ref, b2_ref, w3_ref, b3_ref, o_ref):
    """One batch tile of the value MLP, computed in (features, batch) layout.

    x_ref : (tm, state_dim)   f32    batch tile (rows = batch); cast to bf16 in VMEM
    w1_ref: (128, state_dim)  bf16   PyTorch (out, in) layout
    b1_ref: (128, 1)          f32
    w2_ref: (128, 128)        bf16
    b2_ref: (128, 1)          f32
    w3_ref: (128, 1)          f32    value-head weight as a column (VPU path, no MXU)
    b3_ref: (1, 1)            f32    SMEM scalar
    o_ref : (1, tm)           f32    lane-dense output row
    """
    # Cast in VMEM: x arrives as f32 (4 B/elem HBM) instead of a separate
    # wrapper-side astype pass (4R + 2W + 2R per element).
    x = x_ref[...].astype(jnp.bfloat16)                      # (tm, sd) bf16

    # h1^T = relu(W1 @ x^T + b1): contract the last dims of both operands
    # ("A @ B^T"), no explicit transpose; f32 accumulation on the MXU.
    # TODO(synk): if sibling heads (e.g. a policy head) consume the same x,
    # stack their W1 rows into one stationary (<=256, state_dim) operand to
    # fill more of the 256-deep MXU on v6e/v7x.
    h1 = lax.dot_general(
        w1_ref[...], x, (((1,), (1,)), ((), ())),
        preferred_element_type=jnp.float32)                  # (128, tm) f32
    h1 = jnp.maximum(h1 + b1_ref[...], 0.0)                  # f32 VPU (v5e: no bf16 VALU)

    h2 = jnp.dot(w2_ref[...], h1.astype(jnp.bfloat16),
                 preferred_element_type=jnp.float32)         # (128, tm) f32
    h2 = jnp.maximum(h2 + b2_ref[...], 0.0)

    # Value head: a (1,128)@(128,tm) MXU matmul would stream all of h2 for one
    # useful output row; do it on the VPU + sublane reduce (XLU) instead --
    # both units have slack while the MXU is the binding unit.
    v = jnp.sum(w3_ref[...] * h2, axis=0, keepdims=True)     # (1, tm) f32
    o_ref[...] = (v + b3_ref[0, 0]).astype(o_ref.dtype)


def value_forward(x, params, *, tm_max=1024):
    """x: (B, state_dim) float32 -> (B, 1) float32."""
    w1, b1, w2, b2, w3, b3 = params
    B, state_dim = x.shape

    tm = _choose_tm(B, tm_max)
    grid = (pl.cdiv(B, tm),)
    Bp = grid[0] * tm          # output padded up to whole tiles; sliced back below

    # x stays f32 and is NOT padded in the wrapper; the ragged last block reads
    # past the array and those columns are discarded by the [:, :B] slice.
    w1b = w1.astype(jnp.bfloat16)
    w2b = w2.astype(jnp.bfloat16)
    w3c = jnp.transpose(w3).astype(jnp.float32)   # (128, 1) column for the VPU value head
    b1f = b1.astype(jnp.float32)
    b2f = b2.astype(jnp.float32)
    b3f = b3.astype(jnp.float32)                  # (1, 1) SMEM scalar

    flops = 2 * Bp * (state_dim * HIDDEN + HIDDEN * HIDDEN + HIDDEN)
    bytes_accessed = (
        B * state_dim * 4                                         # x (f32)
        + (HIDDEN * state_dim + HIDDEN * HIDDEN) * 2              # w1, w2 (bf16)
        + (HIDDEN + 2 * HIDDEN + 1) * 4                           # w3 col + biases (f32)
        + Bp * 4)                                                 # output (f32)

    # Note: replicated weight/bias specs could use pipeline_mode=pl.Buffered(1) to
    # drop one buffer each (~40 KiB VMEM); left at the default for robustness.
    out_row = pl.pallas_call(
        value_mlp_kernel,
        out_shape=jax.ShapeDtypeStruct((1, Bp), jnp.float32),
        grid_spec=pltpu.PrefetchScalarGridSpec(
            num_scalar_prefetch=0,
            grid=grid,
            in_specs=[
                pl.BlockSpec((tm, state_dim), lambda i: (i, 0)),        # x tile (f32)
                pl.BlockSpec((HIDDEN, state_dim), lambda i: (0, 0)),    # w1 (resident)
                pl.BlockSpec((HIDDEN, 1), lambda i: (0, 0)),            # b1
                pl.BlockSpec((HIDDEN, HIDDEN), lambda i: (0, 0)),       # w2
                pl.BlockSpec((HIDDEN, 1), lambda i: (0, 0)),            # b2
                pl.BlockSpec((HIDDEN, 1), lambda i: (0, 0)),            # w3 column
                pl.BlockSpec(memory_space=pltpu.MemorySpace.SMEM),      # b3 scalar
            ],
            out_specs=pl.BlockSpec((1, tm), lambda i: (0, i)),          # lane-dense row
        ),
        compiler_params=pltpu.CompilerParams(
            dimension_semantics=("parallel",),
        ),
        cost_estimate=pl.CostEstimate(
            flops=flops, transcendentals=0, bytes_accessed=bytes_accessed),
    )(x, w1b, b1f, w2b, b2f, w3c, b3f)

    return out_row[:, :B].reshape(B, 1)


def init_value_params(key, state_dim):
    """Mirror nn.Linear default init U(-1/sqrt(fan_in), 1/sqrt(fan_in)).

    Weights stored (out_features, in_features) like PyTorch; biases as (out, 1)."""
    def linear_init(k, fan_in, fan_out):
        kw, kb = jax.random.split(k)
        bound = 1.0 / jnp.sqrt(jnp.float32(fan_in))
        w = jax.random.uniform(kw, (fan_out, fan_in), jnp.float32, -bound, bound)
        b = jax.random.uniform(kb, (fan_out, 1), jnp.float32, -bound, bound)
        return w, b

    k1, k2, k3 = jax.random.split(key, 3)
    w1, b1 = linear_init(k1, state_dim, HIDDEN)
    w2, b2 = linear_init(k2, HIDDEN, HIDDEN)
    w3, b3 = linear_init(k3, HIDDEN, 1)
    return (w1, b1, w2, b2, w3, b3)


def value_reference(x, params):
    """Pure-JAX (f32) reference of the PyTorch forward."""
    w1, b1, w2, b2, w3, b3 = params
    h1 = jnp.maximum(x @ w1.T + b1.T, 0.0)
    h2 = jnp.maximum(h1 @ w2.T + b2.T, 0.0)
    return h2 @ w3.T + b3.T


if __name__ == "__main__":
    key = jax.random.PRNGKey(0)
    kx, kp = jax.random.split(key)

    state_dim = 32
    params = init_value_params(kp, state_dim)

    # B=8 : exact single tile.  B=10: single ragged tile (reads past x, sliced off).
    # B=300: two tiles of 128/256 -> multi-tile + ragged-last-block + megacore path.
    for B in (8, 10, 300):
        x = jax.random.normal(jax.random.fold_in(kx, B), (B, state_dim), jnp.float32)
        out = jax.block_until_ready(value_forward(x, params))
        ref = value_reference(x, params)
        assert out.shape == (B, 1)
        # bf16 MXU inputs with f32 accumulation -> loosened tolerance vs f32 reference.
        assert jnp.allclose(out, ref, atol=3e-2, rtol=3e-2), f"mismatch vs reference at B={B}"

    print("KERNEL_OK")
</pallas_src>

<mosaic_0001>
module attributes {stable_mosaic.version = 11 : i64} {
  func.func @value_mlp_kernel(%arg0: i32, %arg1: memref<8x32xf32, #tpu.memory_space<vmem>>, %arg2: memref<128x32xbf16, #tpu.memory_space<vmem>>, %arg3: memref<128x1xf32, #tpu.memory_space<vmem>>, %arg4: memref<128x128xbf16, #tpu.memory_space<vmem>>, %arg5: memref<128x1xf32, #tpu.memory_space<vmem>>, %arg6: memref<128x1xf32, #tpu.memory_space<vmem>>, %arg7: memref<1x1xf32, #tpu.memory_space<smem>>, %arg8: memref<1x8xf32, #tpu.memory_space<vmem>>) attributes {dimension_semantics = [#tpu.dimension_semantics<parallel>], iteration_bounds = array<i64: 1>, scalar_prefetch = 0 : i64, scratch_operands = 0 : i64, tpu.core_type = #tpu.core_type<tc>, window_params = [{transform_indices = @transform_0, window_bounds = array<i64: 8, 32>}, {pipeline_mode = #tpu.pipeline_mode<synchronous>, transform_indices = @transform_1, window_bounds = array<i64: 128, 32>}, {pipeline_mode = #tpu.pipeline_mode<synchronous>, transform_indices = @transform_2, window_bounds = array<i64: 128, 1>}, {pipeline_mode = #tpu.pipeline_mode<synchronous>, transform_indices = @transform_3, window_bounds = array<i64: 128, 128>}, {pipeline_mode = #tpu.pipeline_mode<synchronous>, transform_indices = @transform_4, window_bounds = array<i64: 128, 1>}, {pipeline_mode = #tpu.pipeline_mode<synchronous>, transform_indices = @transform_5, window_bounds = array<i64: 128, 1>}, {transform_indices = @transform_6, window_bounds = array<i64: 1, 1>}, {transform_indices = @transform_7, window_bounds = array<i64: 1, 8>}]} {
    %c0 = arith.constant 0 : index
    %c0_0 = arith.constant 0 : index
    %0 = vector.load %arg1[%c0, %c0_0] : memref<8x32xf32, #tpu.memory_space<vmem>>, vector<8x32xf32>
    %1 = arith.truncf %0 : vector<8x32xf32> to vector<8x32xbf16>
    %c0_1 = arith.constant 0 : index
    %c0_2 = arith.constant 0 : index
    %2 = vector.load %arg2[%c0_1, %c0_2] : memref<128x32xbf16, #tpu.memory_space<vmem>>, vector<128x32xbf16>
    %cst = arith.constant dense<0.000000e+00> : vector<128x8xf32>
    %3 = tpu.matmul %2, %1, %cst {dimension_numbers = #tpu.dot_dimension_numbers<[1], [1], [0], [0], [0, 0, 1, 0], [], []>} : vector<128x32xbf16>, vector<8x32xbf16>, vector<128x8xf32> -> vector<128x8xf32>
    %c0_3 = arith.constant 0 : index
    %c0_4 = arith.constant 0 : index
    %4 = vector.load %arg3[%c0_3, %c0_4] : memref<128x1xf32, #tpu.memory_space<vmem>>, vector<128x1xf32>
    %5 = vector.broadcast %4 : vector<128x1xf32> to vector<128x8xf32>
    %6 = arith.addf %3, %5 : vector<128x8xf32>
    %cst_5 = arith.constant 0.000000e+00 : f32
    %7 = vector.broadcast %cst_5 : f32 to vector<128x8xf32>
    %8 = arith.maximumf %6, %7 : vector<128x8xf32>
    %c0_6 = arith.constant 0 : index
    %c0_7 = arith.constant 0 : index
    %9 = vector.load %arg4[%c0_6, %c0_7] : memref<128x128xbf16, #tpu.memory_space<vmem>>, vector<128x128xbf16>
    %10 = arith.truncf %8 : vector<128x8xf32> to vector<128x8xbf16>
    %cst_8 = arith.constant dense<0.000000e+00> : vector<128x8xf32>
    %11 = tpu.matmul %9, %10, %cst_8 {dimension_numbers = #tpu.dot_dimension_numbers<[1], [0], [0], [1], [0, 0, 1, 1], [], []>} : vector<128x128xbf16>, vector<128x8xbf16>, vector<128x8xf32> -> vector<128x8xf32>
    %c0_9 = arith.constant 0 : index
    %c0_10 = arith.constant 0 : index
    %12 = vector.load %arg5[%c0_9, %c0_10] : memref<128x1xf32, #tpu.memory_space<vmem>>, vector<128x1xf32>
    %13 = vector.broadcast %12 : vector<128x1xf32> to vector<128x8xf32>
    %14 = arith.addf %11, %13 : vector<128x8xf32>
    %cst_11 = arith.constant 0.000000e+00 : f32
    %15 = vector.broadcast %cst_11 : f32 to vector<128x8xf32>
    %16 = arith.maximumf %14, %15 : vector<128x8xf32>
    %c0_12 = arith.constant 0 : index
    %c0_13 = arith.constant 0 : index
    %17 = vector.load %arg6[%c0_12, %c0_13] : memref<128x1xf32, #tpu.memory_space<vmem>>, vector<128x1xf32>
    %18 = vector.broadcast %17 : vector<128x1xf32> to vector<128x8xf32>
    %19 = arith.mulf %18, %16 : vector<128x8xf32>
    %cst_14 = arith.constant dense<0.000000e+00> : vector<8xf32>
    %20 = vector.multi_reduction <add>, %19, %cst_14 [0] : vector<128x8xf32> to vector<8xf32>
    %21 = vector.shape_cast %20 : vector<8xf32> to vector<1x8xf32>
    %c0_15 = arith.constant 0 : index
    %c0_16 = arith.constant 0 : index
    %22 = memref.load %arg7[%c0_15, %c0_16] : memref<1x1xf32, #tpu.memory_space<smem>>
    %23 = vector.broadcast %22 : f32 to vector<1x8xf32>
    %24 = arith.addf %21, %23 : vector<1x8xf32>
    %c0_17 = arith.constant 0 : index
    %c0_18 = arith.constant 0 : index
    %25 = vector.load %arg8[%c0_17, %c0_18] : memref<1x8xf32, #tpu.memory_space<vmem>>, vector<1x8xf32>
    tpu.vector_store %arg8[%c0_17, %c0_18], %24 {strides = array<i32>} : memref<1x8xf32, #tpu.memory_space<vmem>>, vector<1x8xf32>,
    return
  }
  func.func @transform_0(%arg0: i32) -> (i32, i32) {
    %c0_i32 = arith.constant 0 : i32
    %c0_i32_0 = arith.constant 0 : i32
    return %arg0, %c0_i32 : i32, i32
  }
  func.func @transform_1(%arg0: i32) -> (i32, i32) {
    %c0_i32 = arith.constant 0 : i32
    %c0_i32_0 = arith.constant 0 : i32
    %c0_i32_1 = arith.constant 0 : i32
    return %c0_i32, %c0_i32_0 : i32, i32
  }
  func.func @transform_2(%arg0: i32) -> (i32, i32) {
    %c0_i32 = arith.constant 0 : i32
    %c0_i32_0 = arith.constant 0 : i32
    %c0_i32_1 = arith.constant 0 : i32
    return %c0_i32, %c0_i32_0 : i32, i32
  }
  func.func @transform_3(%arg0: i32) -> (i32, i32) {
    %c0_i32 = arith.constant 0 : i32
    %c0_i32_0 = arith.constant 0 : i32
    %c0_i32_1 = arith.constant 0 : i32
    return %c0_i32, %c0_i32_0 : i32, i32
  }
  func.func @transform_4(%arg0: i32) -> (i32, i32) {
    %c0_i32 = arith.constant 0 : i32
    %c0_i32_0 = arith.constant 0 : i32
    %c0_i32_1 = arith.constant 0 : i32
    return %c0_i32, %c0_i32_0 : i32, i32
  }
  func.func @transform_5(%arg0: i32) -> (i32, i32) {
    %c0_i32 = arith.constant 0 : i32
    %c0_i32_0 = arith.constant 0 : i32
    %c0_i32_1 = arith.constant 0 : i32
    return %c0_i32, %c0_i32_0 : i32, i32
  }
  func.func @transform_6(%arg0: i32) -> (i32, i32) {
    %c0_i32 = arith.constant 0 : i32
    %c0_i32_0 = arith.constant 0 : i32
    %c0_i32_1 = arith.constant 0 : i32
    return %c0_i32, %c0_i32_0 : i32, i32
  }
  func.func @transform_7(%arg0: i32) -> (i32, i32) {
    %c0_i32 = arith.constant 0 : i32
    %c0_i32_0 = arith.constant 0 : i32
    return %c0_i32, %arg0 : i32, i32
  }
}

</mosaic_0001>

<bundles_post_ra>
// kernel: tpu_custom_call.1
= control target key start
LH: loop header
LB: loop body
LE: loop exit
PB: predicated region body
PF: predicated region fallthrough
CT: control target
= control target key end

     0   :  { %v808_v3 = vmov 0   ;;  %vm183_vm0 = vcmask 261120   ;;  %s1104_s0 = inlined_call_operand.vmem [shape: f32[8,32], index: 0, kind: input, shape index: {}]   ;;  %s1105_s1 = inlined_call_operand.vmem [shape: bf16[128,32], index: 1, kind: input, shape index: {}]   ;;  %s1106_s2 = inlined_call_operand.vmem [shape: f32[128,1], index: 2, kind: input, shape index: {}]   ;;  %s1107_s3 = inlined_call_operand.vmem [shape: bf16[128,128], index: 3, kind: input, shape index: {}]   ;;  %s1108_s4 = inlined_call_operand.vmem [shape: f32[128,1], index: 4, kind: input, shape index: {}]   ;;  %s1109_s5 = inlined_call_operand.vmem [shape: f32[128,1], index: 5, kind: input, shape index: {}]   ;;  %s1110_s6 = inlined_call_operand.<no memory space> [shape: f32[1,1], index: 6, kind: input, shape index: {}]   ;;  %s1111_s7 = inlined_call_operand.hbm [shape: f32[1,8], index: 7, kind: output, shape index: {}]  }
   0x1   :  { %v61_v0 = vld [vmem:[%s1106_s2 + $0x70] sm:$0xff]  ;;  %v59_v1 = vld [vmem:[%s1106_s2 + $0x60] sm:$0xff]  ;;  %781 = vset.pattern.permute.xlu2 %v808_v3  ;;  %780 = vset.pattern.permute.xlu1 %v808_v3  ;;  %v62_v7 = vld [vmem:[%s1106_s2 + $0x78] sm:$0xff] }
   0x2   :  { %v57_v2 = vld [vmem:[%s1106_s2 + $0x50] sm:$0xff]  ;;  %v29_v4 = vld [vmem:[%s1104_s0] sm:$0xff]  ;;  %779 = vset.pattern.permute.xlu0 %v808_v3  ;;  %125 = vperm.xlu1 %780, %v59_v1   ;;  %v60_v8 = vld [vmem:[%s1106_s2 + $0x68] sm:$0xff] }
   0x3   :  { %v30_v5 = vpack.c.bf16 %v29_v4, %v29_v4  ;;  %135 = vperm.xlu0 %779, %v61_v0   ;;  %115 = vperm.xlu2 %781, %v57_v2  }
   0x5   :  { %v209_v6 = vsel %vm183_vm0, %v30_v5, 0 }
   0x6   :  { %218 = vmatpush.bf16.xpose.msra.mxu0 %v209_v6  ;;  %768 = vmatpush.bf16.xpose.msra.mxu3 %v209_v6 }
   0x7   :  { %13 = vsyncpa [#allocation4], 0  ;;  %v58_v9 = vld [vmem:[%s1106_s2 + $0x58] sm:$0xff]  ;;  %v752_v10 = vld [vmem:[%s1105_s1] sm:$0xff]  ;;  %vm621_vm1 = vcmask 64512   ;;  %s809_s26 = smov [#allocation3]  }
   0x8   :  { %v757_v11 = vld [vmem:[%s1105_s1 + $0x28] sm:$0xff]  ;;  %v55_v13 = vld [vmem:[%s1106_s2 + $0x40] sm:$0xff]  ;;  %v53_v14 = vld [vmem:[%s1106_s2 + $0x30] sm:$0xff]  ;;  %s669_s27 = sshll.u32 %s809_s26, 4  ;;  %s671_s30 = sshll.u32 %s1111_s7, 4  ;;  %vm662_vm2 = vcmask 57344   ;;  %s670_s27 = int_to_ptr.vmem [resolvable:$true] %s669_s27  ;;  %s672_s30 = int_to_ptr.hbm [resolvable:$true] %s671_s30 }
   0x9   :  { %v56_v12 = vld [vmem:[%s1106_s2 + $0x48] sm:$0xff]  ;;  %v54_v15 = vld [vmem:[%s1106_s2 + $0x38] sm:$0xff]  ;;  %v51_v16 = vld [vmem:[%s1106_s2 + $0x20] sm:$0xff] }
   0xa   :  { %130 = vperm.xlu1 %780, %v60_v8   ;;  %v52_v17 = vld [vmem:[%s1106_s2 + $0x28] sm:$0xff]  ;;  %v758_v19 = vld [vmem:[%s1105_s1 + $0x30] sm:$0xff]  ;;  %v50_v20 = vld [vmem:[%s1106_s2 + $0x18] sm:$0xff] }
   0xb   :  { %140 = vperm.xlu0 %779, %v62_v7   ;;  %120 = vperm.xlu2 %781, %v58_v9   ;;  %v753_v18 = vld [vmem:[%s1105_s1 + $0x8] sm:$0xff]  ;;  %v49_v21 = vld [vmem:[%s1106_s2 + $0x10] sm:$0xff]  ;;  %v47_v22 = vld [vmem:[%s1106_s2] sm:$0xff] }
   0xc   :  { %v300_v23 = vld [vmem:[%s1108_s4] sm:$0xff]  ;;  %v48_v24 = vld [vmem:[%s1106_s2 + $0x8] sm:$0xff]  ;;  %v754_v26 = vld [vmem:[%s1105_s1 + $0x10] sm:$0xff] }
   0xd   :  { %712 = vmatmul.msk.bf16.vlgmr.msra.gmra.mxu0 %vm183_vm0, %v752_v10  ;;  %717 = vmatmul.msk.bf16.vlgmr.msra.gmra.mxu3 %vm183_vm0, %v757_v11  ;;  %v301_v25 = vld [vmem:[%s1108_s4 + $0x8] sm:$0xff]  ;;  %v759_v27 = vld [vmem:[%s1105_s1 + $0x38] sm:$0xff]  ;;  %v302_v29 = vld [vmem:[%s1108_s4 + $0x10] sm:$0xff] }
   0xe   :  { %v303_v28 = vld [vmem:[%s1108_s4 + $0x18] sm:$0xff]  ;;  %v304_v30 = vld [vmem:[%s1108_s4 + $0x20] sm:$0xff]  ;;  %v306_v31 = vld [vmem:[%s1108_s4 + $0x30] sm:$0xff] }
   0xf   :  { %v305_v32 = vld [vmem:[%s1108_s4 + $0x28] sm:$0xff]  ;;  %v307_v33 = vld [vmem:[%s1108_s4 + $0x38] sm:$0xff]  ;;  %v308_v36 = vld [vmem:[%s1108_s4 + $0x40] sm:$0xff] }
  0x10   :  { %v755_v34 = vld [vmem:[%s1105_s1 + $0x18] sm:$0xff]  ;;  %v309_v35 = vld [vmem:[%s1108_s4 + $0x48] sm:$0xff]  ;;  %v310_v37 = vld [vmem:[%s1108_s4 + $0x50] sm:$0xff] }
  0x11   :  { %v312_v38 = vld [vmem:[%s1108_s4 + $0x60] sm:$0xff]  ;;  %v311_v39 = vld [vmem:[%s1108_s4 + $0x58] sm:$0xff]  ;;  %v313_v40 = vld [vmem:[%s1108_s4 + $0x68] sm:$0xff] }
  0x12   :  { %110 = vperm.xlu1 %780, %v56_v12   ;;  %v756_v41 = vld [vmem:[%s1105_s1 + $0x20] sm:$0xff]  ;;  %v315_v42 = vld [vmem:[%s1108_s4 + $0x78] sm:$0xff]  ;;  %v314_v43 = vld [vmem:[%s1108_s4 + $0x70] sm:$0xff] }
  0x13   :  { %105 = vperm.xlu0 %779, %v55_v13   ;;  %95 = vperm.xlu2 %781, %v53_v14   ;;  %v509_v44 = vld [vmem:[%s1109_s5] sm:$0xff]  ;;  %v511_v45 = vld [vmem:[%s1109_s5 + $0x10] sm:$0xff]  ;;  %v510_v46 = vld [vmem:[%s1109_s5 + $0x8] sm:$0xff] }
  0x14   :  { %v512_v47 = vld [vmem:[%s1109_s5 + $0x18] sm:$0xff]  ;;  %v514_v48 = vld [vmem:[%s1109_s5 + $0x28] sm:$0xff]  ;;  %v513_v49 = vld [vmem:[%s1109_s5 + $0x20] sm:$0xff] }
  0x15   :  { %v515_v50 = vld [vmem:[%s1109_s5 + $0x30] sm:$0xff]  ;;  %v517_v51 = vld [vmem:[%s1109_s5 + $0x40] sm:$0xff]  ;;  %v516_v52 = vld [vmem:[%s1109_s5 + $0x38] sm:$0xff] }
  0x16   :  { %v518_v53 = vld [vmem:[%s1109_s5 + $0x48] sm:$0xff]  ;;  %v520_v54 = vld [vmem:[%s1109_s5 + $0x58] sm:$0xff]  ;;  %v519_v55 = vld [vmem:[%s1109_s5 + $0x50] sm:$0xff] }
  0x17   :  { %v521_v56 = vld [vmem:[%s1109_s5 + $0x60] sm:$0xff]  ;;  %v523_v59 = vld [vmem:[%s1109_s5 + $0x70] sm:$0xff]  ;;  %v522_v60 = vld [vmem:[%s1109_s5 + $0x68] sm:$0xff] }
  0x18   :  { %v524_v61 = vld [vmem:[%s1109_s5 + $0x78] sm:$0xff] }
  0x1a   :  { %85 = vperm.xlu1 %780, %v51_v16  }
  0x1b   :  { %100 = vperm.xlu0 %779, %v54_v15   ;;  %90 = vperm.xlu2 %781, %v52_v17  }
  0x1d   :  { %713 = vmatmul.msk.bf16.gmra.mxu0 %vm183_vm0, %v753_v18  ;;  %718 = vmatmul.msk.bf16.gmra.mxu3 %vm183_vm0, %v758_v19 }
  0x22   :  { %80 = vperm.xlu1 %780, %v50_v20  }
  0x23   :  { %75 = vperm.xlu0 %779, %v49_v21   ;;  %65 = vperm.xlu2 %781, %v47_v22  }
  0x2a   :  { %318 = vperm.xlu1 %780, %v300_v23  }
  0x2b   :  { %70 = vperm.xlu0 %779, %v48_v24   ;;  %323 = vperm.xlu2 %781, %v301_v25  }
  0x2d   :  { %714 = vmatmul.msk.bf16.gmra.mxu0 %vm183_vm0, %v754_v26  ;;  %719 = vmatmul.msk.bf16.gmra.mxu3 %vm183_vm0, %v759_v27 }
  0x32   :  { %333 = vperm.xlu1 %780, %v303_v28  }
  0x33   :  { %328 = vperm.xlu0 %779, %v302_v29   ;;  %338 = vperm.xlu2 %781, %v304_v30  }
  0x3a   :  { %348 = vperm.xlu1 %780, %v306_v31  }
  0x3b   :  { %343 = vperm.xlu0 %779, %v305_v32   ;;  %353 = vperm.xlu2 %781, %v307_v33  }
  0x3d   :  { %715 = vmatmul.msk.bf16.gmra.mxu0 %vm183_vm0, %v755_v34 }
  0x42   :  { %363 = vperm.xlu1 %780, %v309_v35  }
  0x43   :  { %358 = vperm.xlu0 %779, %v308_v36   ;;  %368 = vperm.xlu2 %781, %v310_v37  }
  0x4a   :  { %378 = vperm.xlu1 %780, %v312_v38  }
  0x4b   :  { %373 = vperm.xlu0 %779, %v311_v39   ;;  %383 = vperm.xlu2 %781, %v313_v40  }
  0x4d   :  { %716 = vmatmul.msk.bf16.gmra.mxu0 %vm183_vm0, %v756_v41 }
  0x52   :  { %393 = vperm.xlu1 %780, %v315_v42  }
  0x53   :  { %388 = vperm.xlu0 %779, %v314_v43   ;;  %527 = vperm.xlu2 %781, %v509_v44  }
  0x5a   :  { %537 = vperm.xlu1 %780, %v511_v45  }
  0x5b   :  { %532 = vperm.xlu0 %779, %v510_v46   ;;  %542 = vperm.xlu2 %781, %v512_v47  }
  0x5d   :  { %v116_v57 = vpop.permute.xlu2 %115 }
  0x62   :  { %552 = vperm.xlu1 %780, %v514_v48  }
  0x63   :  { %547 = vperm.xlu0 %779, %v513_v49   ;;  %557 = vperm.xlu2 %781, %v515_v50  }
  0x65   :  { %v121_v62 = vpop.permute.xlu2 %120 }
  0x6a   :  { %567 = vperm.xlu1 %780, %v517_v51  }
  0x6b   :  { %562 = vperm.xlu0 %779, %v516_v52   ;;  %572 = vperm.xlu2 %781, %v518_v53  }
  0x6d   :  { %v96_v1 = vpop.permute.xlu2 %95 }
  0x72   :  { %582 = vperm.xlu1 %780, %v520_v54  }
  0x73   :  { %577 = vperm.xlu0 %779, %v519_v55   ;;  %587 = vperm.xlu2 %781, %v521_v56  }
  0x74   :  { %v126_v21 = vpop.permute.xlu1 %125 }
  0x75   :  { %v136_v58 = vpop.permute.xlu0 %135  ;;  %v91_v5 = vpop.permute.xlu2 %90 }
  0x7a   :  { %597 = vperm.xlu1 %780, %v523_v59  }
  0x7b   :  { %592 = vperm.xlu0 %779, %v522_v60   ;;  %602 = vperm.xlu2 %781, %v524_v61  }
  0x7c   :  { %v131_v25 = vpop.permute.xlu1 %130 }
  0x7d   :  { %v141_v63 = vpop.permute.xlu0 %140  ;;  %v66_v10 = vpop.permute.xlu2 %65 }
  0x84   :  { %v111_v43 = vpop.permute.xlu1 %110 }
  0x85   :  { %v106_v0 = vpop.permute.xlu0 %105 }
  0x8a   :  { %v220_v2 = vpop.f32.mrf.mxu0 }
  0x8b   :  { %v221_v11 = vadd.f32 %v220_v2, %v66_v10  ;;  %v763_v10 = vld [vmem:[%s1107_s3 + $0x18] sm:$0xff] }
  0x8c   :  { %v86_v45 = vpop.permute.xlu1 %85 }
  0x8d   :  { %v101_v3 = vpop.permute.xlu0 %100  ;;  %v260_v15 = vmax.f32 %v221_v11, 0.0  ;;  %v767_v11 = vld [vmem:[%s1107_s3 + $0x38] sm:$0xff] }
  0x90   :  { %v245_v4 = vpop.f32.mrf.mxu3 }
  0x91   :  { %v246_v33 = vadd.f32 %v245_v4, %v116_v57  ;;  %v760_v4 = vld [vmem:[%s1107_s3] sm:$0xff] }
  0x92   :  { %v222_v6 = vpop.f32.mrf.mxu0 }
  0x93   :  { %v270_v38 = vmax.f32 %v246_v33, 0.0 }
  0x95   :  { %v1030_v7 = vpop.permute.xlu0 %75 }
  0x98   :  { %v247_v8 = vpop.f32.mrf.mxu3 }
  0x99   :  { %v248_v34 = vadd.f32 %v247_v8, %v121_v62  ;;  %v762_v8 = vld [vmem:[%s1107_s3 + $0x10] sm:$0xff] }
  0x9a   :  { %v225_v9 = vpop.f32.mrf.mxu0 }
  0x9b   :  { %v271_v39 = vmax.f32 %v248_v34, 0.0  ;;  %v226_v62 = vadd.f32 %v225_v9, %v1030_v7  ;;  %v765_v7 = vld [vmem:[%s1107_s3 + $0x28] sm:$0xff]  ;;  %v766_v9 = vld [vmem:[%s1107_s3 + $0x30] sm:$0xff] }
  0x9d   :  { %v71_v12 = vpop.permute.xlu0 %70  ;;  %v297_v42 = vpack.c.bf16 %v271_v39, %v270_v38  ;;  %v262_v2 = vmax.f32 %v226_v62, 0.0 }
  0x9e   :  { %v223_v13 = vadd.f32 %v222_v6, %v71_v12  ;;  %v761_v6 = vld [vmem:[%s1107_s3 + $0x8] sm:$0xff] }
  0xa0   :  { %v250_v14 = vpop.f32.mrf.mxu3  ;;  %v261_v16 = vmax.f32 %v223_v13, 0.0  ;;  %v324_v13 = vpop.permute.xlu2 %323 }
  0xa1   :  { %v251_v27 = vadd.f32 %v250_v14, %v126_v21 }
  0xa2   :  { %v227_v17 = vpop.f32.mrf.mxu0  ;;  %v1032_v18 = vpack.c.bf16 %v261_v16, %v260_v15 }
  0xa3   :  { %v272_v35 = vmax.f32 %v251_v27, 0.0 }
  0xa5   :  { %v329_v14 = vpop.permute.xlu0 %328 }
  0xa8   :  { %v252_v19 = vpop.f32.mrf.mxu3  ;;  %v339_v16 = vpop.permute.xlu2 %338 }
  0xa9   :  { %v253_v28 = vadd.f32 %v252_v19, %v131_v25 }
  0xaa   :  { %v230_v20 = vpop.f32.mrf.mxu0 }
  0xab   :  { %v273_v36 = vmax.f32 %v253_v28, 0.0  ;;  %v231_v56 = vadd.f32 %v230_v20, %v86_v45 }
  0xad   :  { %v298_v40 = vpack.c.bf16 %v273_v36, %v272_v35 }
  0xb0   :  { %v255_v22 = vpop.f32.mrf.mxu3  ;;  %v1061_v19 = vpop.permute.xlu2 %353 }
  0xb1   :  { %v256_v24 = vadd.f32 %v255_v22, %v136_v58  ;;  %v81_v58 = vpop.permute.xlu1 %80 }
  0xb2   :  { %v232_v23 = vpop.f32.mrf.mxu0  ;;  %v228_v59 = vadd.f32 %v227_v17, %v81_v58  ;;  %v344_v17 = vpop.permute.xlu0 %343 }
  0xb3   :  { %v274_v29 = vmax.f32 %v256_v24, 0.0  ;;  %v233_v53 = vadd.f32 %v232_v23, %v91_v5  ;;  %v764_v5 = vld [vmem:[%s1107_s3 + $0x20] sm:$0xff] }
  0xb5   :  { %v265_v60 = vmax.f32 %v233_v53, 0.0 }
  0xb8   :  { %v257_v26 = vpop.f32.mrf.mxu3  ;;  %v1063_v23 = vpop.permute.xlu2 %368 }
  0xb9   :  { %v258_v30 = vadd.f32 %v257_v26, %v141_v63  ;;  %v264_v63 = vmax.f32 %v231_v56, 0.0  ;;  %v319_v12 = vpop.permute.xlu1 %318 }
  0xba   :  { %v235_v31 = vpop.f32.mrf.mxu0  ;;  %v359_v20 = vpop.permute.xlu0 %358 }
  0xbb   :  { %v275_v32 = vmax.f32 %v258_v30, 0.0  ;;  %v236_v50 = vadd.f32 %v235_v31, %v96_v1  ;;  %v294_v1 = vpack.c.bf16 %v265_v60, %v264_v63 }
  0xbd   :  { %v299_v37 = vpack.c.bf16 %v275_v32, %v274_v29  ;;  %v266_v57 = vmax.f32 %v236_v50, 0.0 }
  0xbf   :  { %444 = vmatpush.bf16.msra.mxu1 %v299_v37  ;;  %769 = vmatpush.bf16.msra.mxu2 %v299_v37 }
  0xc0   :  { %v1069_v28 = vpop.permute.xlu2 %383 }
  0xc1   :  { %v334_v15 = vpop.permute.xlu1 %333 }
  0xc2   :  { %v237_v41 = vpop.f32.mrf.mxu0  ;;  %v1065_v26 = vpop.permute.xlu0 %373 }
  0xc3   :  { %445 = vmatpush.bf16.msra.mxu1 %v298_v40  ;;  %770 = vmatpush.bf16.msra.mxu2 %v298_v40  ;;  %v238_v48 = vadd.f32 %v237_v41, %v101_v3 }
  0xc5   :  { %v267_v54 = vmax.f32 %v238_v48, 0.0 }
  0xc7   :  { %446 = vmatpush.bf16.msra.mxu1 %v297_v42  ;;  %771 = vmatpush.bf16.msra.mxu2 %v297_v42  ;;  %v295_v61 = vpack.c.bf16 %v267_v54, %v266_v57 }
  0xc8   :  { %v528_v34 = vpop.permute.xlu2 %527 }
  0xca   :  { %v240_v44 = vpop.f32.mrf.mxu0  ;;  %v1071_v31 = vpop.permute.xlu0 %388 }
  0xcb   :  { %v241_v46 = vadd.f32 %v240_v44, %v106_v0  ;;  %v263_v0 = vmax.f32 %v228_v59, 0.0 }
  0xcd   :  { %v268_v51 = vmax.f32 %v241_v46, 0.0  ;;  %v293_v3 = vpack.c.bf16 %v263_v0, %v262_v2 }
  0xd0   :  { %v543_v40 = vpop.permute.xlu2 %542 }
  0xd2   :  { %v242_v47 = vpop.f32.mrf.mxu0  ;;  %v533_v36 = vpop.permute.xlu0 %532 }
  0xd3   :  { %v243_v49 = vadd.f32 %v242_v47, %v111_v43 }
  0xd5   :  { %v269_v52 = vmax.f32 %v243_v49, 0.0 }
  0xd7   :  { %v296_v55 = vpack.c.bf16 %v269_v52, %v268_v51 }
  0xd8   :  { %v558_v53 = vpop.permute.xlu2 %557 }
  0xd9   :  { %447 = vmatpush.bf16.msra.mxu1 %v296_v55  ;;  %772 = vmatpush.bf16.msra.mxu2 %v296_v55 }
  0xda   :  { %v548_v45 = vpop.permute.xlu0 %547 }
  0xdd   :  { %448 = vmatpush.bf16.msra.mxu1 %v295_v61  ;;  %773 = vmatpush.bf16.msra.mxu2 %v295_v61 }
  0xe1   :  { %449 = vmatpush.bf16.msra.mxu1 %v294_v1  ;;  %774 = vmatpush.bf16.msra.mxu2 %v294_v1 }
  0xe2   :  { %v563_v2 = vpop.permute.xlu0 %562 }
  0xe5   :  { %450 = vmatpush.bf16.msra.mxu1 %v293_v3  ;;  %775 = vmatpush.bf16.msra.mxu2 %v293_v3 }
  0xe9   :  { %451 = vmatpush.bf16.msra.mxu1 %v1032_v18  ;;  %776 = vmatpush.bf16.msra.mxu2 %v1032_v18  ;;  %v349_v18 = vpop.permute.xlu1 %348 }
  0xec   :  { %452 = vmatmul.bf16.vlgmr.msra.gmra.mxu1 %v760_v4  ;;  %472 = vmatmul.bf16.vlgmr.msra.gmra.mxu2 %v764_v5 }
  0xf1   :  { %v364_v22 = vpop.permute.xlu1 %363 }
  0xf9   :  { %v1067_v27 = vpop.permute.xlu1 %378 }
  0xfc   :  { %457 = vmatmul.bf16.gmra.mxu1 %v761_v6  ;;  %477 = vmatmul.bf16.gmra.mxu2 %v765_v7 }
 0x101   :  { %v1073_v32 = vpop.permute.xlu1 %393 }
 0x109   :  { %v538_v38 = vpop.permute.xlu1 %537 }
 0x10c   :  { %462 = vmatmul.bf16.gmra.mxu1 %v762_v8  ;;  %482 = vmatmul.bf16.gmra.mxu2 %v766_v9 }
 0x111   :  { %v553_v49 = vpop.permute.xlu1 %552 }
 0x119   :  { %v568_v7 = vpop.permute.xlu1 %567 }
 0x11c   :  { %467 = vmatmul.bf16.gmra.mxu1 %v763_v10  ;;  %487 = vmatmul.bf16.gmra.mxu2 %v767_v11 }
 0x169   :  { %v453_v21 = vpop.f32.mrf.mxu1 }
 0x16a   :  { %v454_v43 = vadd.f32 %v453_v21, %v319_v12  ;;  %v573_v12 = vpop.permute.xlu2 %572 }
 0x16c   :  { %v493_v50 = vmax.f32 %v454_v43, 0.0 }
 0x16e   :  { %v605_v58 = vmul.f32 %v528_v34, %v493_v50 }
 0x16f   :  { %v473_v24 = vpop.f32.mrf.mxu2 }
 0x170   :  { %v622_v3 = vsel %vm621_vm1, %v605_v58, 0.0  ;;  %v474_v9 = vadd.f32 %v473_v24, %v359_v20 }
 0x171   :  { %v455_v25 = vpop.f32.mrf.mxu1 }
 0x172   :  { %v456_v41 = vadd.f32 %v455_v25, %v324_v13  ;;  %v501_v25 = vmax.f32 %v474_v9, 0.0 }
 0x174   :  { %v494_v47 = vmax.f32 %v456_v41, 0.0 }
 0x176   :  { %v606_v54 = vmul.f32 %v533_v36, %v494_v47 }
 0x177   :  { %v475_v29 = vpop.f32.mrf.mxu2 }
 0x178   :  { %v623_v62 = vsel %vm621_vm1, %v606_v54, 0.0 }
 0x179   :  { %v458_v30 = vpop.f32.mrf.mxu1  ;;  %v624_v8 = vadd.f32 %v623_v62, %v622_v3 }
 0x17a   :  { %v459_v44 = vadd.f32 %v458_v30, %v329_v14 }
 0x17c   :  { %v495_v51 = vmax.f32 %v459_v44, 0.0 }
 0x17e   :  { %v607_v59 = vmul.f32 %v538_v38, %v495_v51 }
 0x17f   :  { %v478_v33 = vpop.f32.mrf.mxu2 }
 0x180   :  { %v625_v4 = vsel %vm621_vm1, %v607_v59, 0.0  ;;  %v479_v30 = vadd.f32 %v478_v33, %v1063_v23 }
 0x181   :  { %v460_v35 = vpop.f32.mrf.mxu1  ;;  %v626_v13 = vadd.f32 %v625_v4, %v624_v8 }
 0x182   :  { %v461_v48 = vadd.f32 %v460_v35, %v334_v15  ;;  %v476_v15 = vadd.f32 %v475_v29, %v364_v22  ;;  %v578_v22 = vpop.permute.xlu0 %577  ;;  %v503_v41 = vmax.f32 %v479_v30, 0.0 }
 0x184   :  { %v496_v55 = vmax.f32 %v461_v48, 0.0  ;;  %v502_v24 = vmax.f32 %v476_v15, 0.0  ;;  %v588_v48 = vpop.permute.xlu2 %587  ;;  %v615_v50 = vmul.f32 %v578_v22, %v503_v41 }
 0x186   :  { %v608_v63 = vmul.f32 %v543_v40, %v496_v55  ;;  %v613_v40 = vmul.f32 %v568_v7, %v501_v25  ;;  %v614_v33 = vmul.f32 %v573_v12, %v502_v24 }
 0x187   :  { %v480_v37 = vpop.f32.mrf.mxu2 }
 0x188   :  { %v627_v10 = vsel %vm621_vm1, %v608_v63, 0.0  ;;  %v481_v36 = vadd.f32 %v480_v37, %v1065_v26 }
 0x189   :  { %v463_v39 = vpop.f32.mrf.mxu1 }
 0x18a   :  { %v464_v52 = vadd.f32 %v463_v39, %v339_v16  ;;  %v593_v59 = vpop.permute.xlu0 %592 }
 0x18c   :  { %v497_v60 = vmax.f32 %v464_v52, 0.0  ;;  %v603_v3 = vpop.permute.xlu2 %602 }
 0x18e   :  { %v609_v5 = vmul.f32 %v548_v45, %v497_v60  ;;  %v583_v45 = vpop.permute.xlu1 %582 }
 0x18f   :  { %v483_v42 = vpop.f32.mrf.mxu2 }
 0x190   :  { %v629_v16 = vsel %vm621_vm1, %v609_v5, 0.0  ;;  %v484_v43 = vadd.f32 %v483_v42, %v1067_v27  ;;  %v639_v27 = vsel %vm621_vm1, %v614_v33, 0.0 }
 0x191   :  { %v465_v46 = vpop.f32.mrf.mxu1 }
 0x192   :  { %v466_v56 = vadd.f32 %v465_v46, %v344_v17  ;;  %v504_v46 = vmax.f32 %v481_v36, 0.0  ;;  %v505_v51 = vmax.f32 %v484_v43, 0.0 }
 0x194   :  { %v498_v0 = vmax.f32 %v466_v56, 0.0  ;;  %v616_v42 = vmul.f32 %v583_v45, %v504_v46 }
 0x196   :  { %v610_v11 = vmul.f32 %v553_v49, %v498_v0  ;;  %v637_v49 = vsel %vm621_vm1, %v613_v40, 0.0  ;;  %v598_v0 = vpop.permute.xlu1 %597 }
 0x197   :  { %v485_v57 = vpop.f32.mrf.mxu2 }
 0x198   :  { %v631_v34 = vsel %vm621_vm1, %v610_v11, 0.0 }
 0x199   :  { %v468_v61 = vpop.f32.mrf.mxu1 }
 0x19a   :  { %v469_v1 = vadd.f32 %v468_v61, %v349_v18  ;;  %v628_v18 = vadd.f32 %v627_v10, %v626_v13  ;;  %v643_v61 = vsel %vm621_vm1, %v616_v42, 0.0 }
 0x19c   :  { %v499_v6 = vmax.f32 %v469_v1, 0.0  ;;  %v630_v20 = vadd.f32 %v629_v16, %v628_v18  ;;  %v660_v16 = vstv %s1110_s6 }
 0x19e   :  { %v611_v17 = vmul.f32 %v558_v53, %v499_v6  ;;  %v632_v29 = vadd.f32 %v631_v34, %v630_v20 }
 0x19f   :  { %v488_v14 = vpop.f32.mrf.mxu2 }
 0x1a0   :  { %v633_v38 = vsel %vm621_vm1, %v611_v17, 0.0  ;;  %v489_v52 = vadd.f32 %v488_v14, %v1071_v31 }
 0x1a1   :  { %v470_v21 = vpop.f32.mrf.mxu1  ;;  %v634_v23 = vadd.f32 %v633_v38, %v632_v29 }
 0x1a2   :  { %v471_v35 = vadd.f32 %v470_v21, %v1061_v19  ;;  %v486_v19 = vadd.f32 %v485_v57, %v1069_v28  ;;  %v641_v28 = vsel %vm621_vm1, %v615_v50, 0.0  ;;  %v617_v57 = vmul.f32 %v588_v48, %v505_v51 }
 0x1a3   :  { %v507_v58 = vmax.f32 %v489_v52, 0.0 }
 0x1a4   :  { %v500_v39 = vmax.f32 %v471_v35, 0.0  ;;  %v506_v54 = vmax.f32 %v486_v19, 0.0  ;;  %v645_v1 = vsel %vm621_vm1, %v617_v57, 0.0 }
 0x1a6   :  { %v612_v44 = vmul.f32 %v563_v2, %v500_v39  ;;  %v618_v62 = vmul.f32 %v593_v59, %v506_v54  ;;  %v619_v2 = vmul.f32 %v598_v0, %v507_v58 }
 0x1a7   :  { %v490_v37 = vpop.f32.mrf.mxu2 }
 0x1a8   :  { %v635_v47 = vsel %vm621_vm1, %v612_v44, 0.0  ;;  %v491_v55 = vadd.f32 %v490_v37, %v1073_v32  ;;  %v647_v32 = vsel %vm621_vm1, %v618_v62, 0.0  ;;  %v649_v7 = vsel %vm621_vm1, %v619_v2, 0.0 }
 0x1a9   :  { %v636_v26 = vadd.f32 %v635_v47, %v634_v23 }
 0x1aa   :  { %v508_v63 = vmax.f32 %v491_v55, 0.0 }
 0x1ab   :  { %v638_v53 = vadd.f32 %v637_v49, %v636_v26 }
 0x1ac   :  { %v620_v5 = vmul.f32 %v603_v3, %v508_v63 }
 0x1ad   :  { %v640_v56 = vadd.f32 %v639_v27, %v638_v53 }
 0x1ae   :  { %v651_v9 = vsel %vm621_vm1, %v620_v5, 0.0 }
 0x1af   :  { %v642_v60 = vadd.f32 %v641_v28, %v640_v56 }
 0x1b1   :  { %v644_v31 = vadd.f32 %v643_v61, %v642_v60 }
 0x1b3   :  { %v646_v4 = vadd.f32 %v645_v1, %v644_v31 }
 0x1b5   :  { %v648_v6 = vadd.f32 %v647_v32, %v646_v4 }
 0x1b7   :  { %v650_v8 = vadd.f32 %v649_v7, %v648_v6 }
 0x1b9   :  { %v652_v10 = vadd.f32 %v651_v9, %v650_v8 }
 0x1bb   :  { %v653_v11 = vrot.slane %v652_v10, 4 }
 0x1bd   :  { %v654_v12 = vadd.f32 %v653_v11, %v652_v10 }
 0x1bf   :  { %v655_v13 = vrot.slane %v654_v12, 2 }
 0x1c1   :  { %v656_v14 = vadd.f32 %v655_v13, %v654_v12 }
 0x1c3   :  { %v657_v15 = vrot.slane %v656_v14, 1 }
 0x1c5   :  { %v658_v17 = vadd.f32 %v657_v15, %v656_v14 }
 0x1c7   :  { %v661_v18 = vadd.f32 %v660_v16, %v658_v17 }
 0x1c9   :  { %663 = vst.msk [vmem:[#allocation3] sm:$0x1] %vm662_vm2, %v661_v18 }
 0x1ca   :  { %674 = dma.vmem_to_hbm [thread:$0]  %s670_s27, 16, %s672_s30, [#allocation4]  }
 0x1cb   :  { %806 = dma.done.wait [#allocation4], 16  }
 0x1cc   :  { %807 = vsyncadd [#allocation4], 4294967280 }
 0x1cd   :  { %679 = vsyncpa [#allocation4], 1 }

</bundles_post_ra>
